<compile_context>
chip_gen: v7x
topology: tpu7x:2x2x1
jax: 0.10.0
libtpu: 0.0.40
codegen_flags: <defaults>
</compile_context>

<pallas_src>
import functools

import jax
import jax.numpy as jnp
from jax import lax
from jax.experimental import pallas as pl
from jax.experimental.pallas import tpu as pltpu


# ----------------------------------------------------------------------------- kernels

def _softmax_kernel(x_ref, p_ref, m_ref):
    """Channel softmax for one spatial tile.

    x_ref: (N, C, TS) f32 logits.
    p_ref: (N, C-1, TS) bf16 probs for classes 1..C-1.
    m_ref: (N, C-1, TS) bf16 0/1 foreground mask (p > 0.5), exact w.r.t. the f32 softmax.
    """
    x = x_ref[...]
    mx = jnp.max(x, axis=1, keepdims=True)             # (N, 1, TS)
    e = jnp.exp(x - mx)                                # (N, C, TS)  -- EUP
    denom = jnp.sum(e, axis=1, keepdims=True)          # (N, 1, TS)
    # NOTE: channel axis is the sublane axis; this offset-1 slice compiled cleanly before
    # (at worst an XLU sublane rotate, an otherwise-idle slot).  Only fg channels are scaled.
    e_fg = e[:, 1:, :]                                 # (N, C-1, TS)
    inv = pl.reciprocal(denom, approx=True)            # EUP vrcp instead of a VPU divide
    p_ref[...] = (e_fg * inv).astype(p_ref.dtype)
    # p > 0.5  <=>  2*e > denom : exact in f32, immune to the approx reciprocal and to the
    # bf16 cast of p (either of which could flip pixels sitting right at the threshold).
    m_ref[...] = jnp.where(2.0 * e_fg > denom, 1.0, 0.0).astype(m_ref.dtype)


def _weighted_sse_kernel(p_ref, dist_ref, t_ref, acc_ref, *, num_fg):
    """Accumulate (gt - p)^2 * dist for one (batch element, spatial tile).

    p_ref:    (1, num_fg, TS) bf16 probs.
    dist_ref: (1, num_fg, TS) f32 distance weights (zero on spatial padding).
    t_ref:    (1, 1, TS) i32 labels.
    acc_ref:  (1, num_fg, TS) f32 output block, resident across the S grid axis
              (constant index_map in s) -> accumulator; zeroed on the first S step.
    """
    s = pl.program_id(1)

    @pl.when(s == 0)
    def _init():
        acc_ref[...] = jnp.zeros_like(acc_ref)

    t = t_ref[...]                                                     # (1, 1, TS)
    cls = lax.broadcasted_iota(jnp.int32, (1, num_fg, t.shape[2]), 1) + 1
    gt = (t == cls).astype(jnp.float32)                                # one-hot (1, num_fg, TS)
    p = p_ref[...].astype(jnp.float32)                                 # upcast (v5e has no bf16 VPU)
    diff = gt - p
    acc_ref[...] += diff * diff * dist_ref[...]                        # pure VPU in the hot loop


# ----------------------------------------------------------------------------- EDT (plain JAX)

def _edt_sq(mask):
    """Exact squared Euclidean distance transform, separable two-pass (no (B,S,S) tensor).

    mask: (B, H, W) bool.  Returns (B, H, W) f32: per pixel, squared distance to the nearest
    False pixel; 0 on False pixels; 0 everywhere if the mask has no False pixels at all
    (degenerate case, matching the brute-force reference).
    """
    B, H, W = mask.shape
    bg = jnp.logical_not(mask)
    big_i = jnp.int32(1 << 20)

    # pass 1: per-row 1-D distance to the nearest background pixel (vectorized scans)
    jj = jnp.broadcast_to(jnp.arange(W, dtype=jnp.int32)[None, None, :], (B, H, W))
    left = lax.cummax(jnp.where(bg, jj, -big_i), axis=2)                 # last bg index <= j
    right = lax.cummin(jnp.where(bg, jj, big_i), axis=2, reverse=True)   # first bg index >= j
    d1 = jnp.minimum(jj - left, right - jj).astype(jnp.float32)
    cap = jnp.float32(H + W)                     # sentinel for rows with no background pixel
    d1 = jnp.minimum(d1, cap)
    g = d1 * d1                                  # (B, H, W) squared row distances

    # pass 2: D2[b,i,j] = min_k ( (i-k)^2 + g[b,k,j] )  -- min-plus over rows, O(H) per pixel.
    # TODO(synk): this min-plus pass could become a Pallas kernel (grid over row tiles,
    # resident running-min accumulator) if the fused (B,H,H,W) reduce ever becomes an issue
    # at very large H; the 1-D scans above are sequential and have no clean Pallas fit.
    ii = jnp.arange(H, dtype=jnp.float32)
    dy2 = (ii[:, None] - ii[None, :]) ** 2                               # (H, H)
    d2 = jnp.min(g[:, None, :, :] + dy2[None, :, :, None], axis=2)      # (B, H, W)

    has_bg = jnp.any(bg, axis=(1, 2), keepdims=True)
    return jnp.where(has_bg, d2, 0.0).astype(jnp.float32)


# ----------------------------------------------------------------------------- wrapper

def hd_loss(logits_nchw, target_nhw, *, ts=2048):
    """HDLoss forward.  `ts` = spatial tile (lanes), kept a multiple of 128.

    Per-step VMEM for kernel 2 ~ 2 * (nfg*ts*(2+4) + 8*ts*4) + 8*ts*4 bytes (double-buffered
    inputs + resident accumulator): tens of KiB even at ts=4096, so VMEM is not the limiter on
    v5e/v6e (32 MiB scoped) or v7x (32 MiB scoped / 64 MiB physical).  ts=2048 default per the
    measured tile-size curve (512 -> 85%, 1024+ -> ~86% of HBM roofline, ~0.35 us/step overhead).
    """
    N, C, H, W = logits_nchw.shape
    S = H * W
    nfg = C - 1

    # tile size: multiple of 128, no larger than S rounded up to 128
    ts = max(128, (int(ts) // 128) * 128)
    ts = min(ts, pl.cdiv(S, 128) * 128)
    s_pad = pl.cdiv(S, ts) * ts
    n_tiles = s_pad // ts

    x = logits_nchw.reshape(N, C, S).astype(jnp.float32)
    t = target_nhw.reshape(N, S).astype(jnp.int32)
    if s_pad != S:
        x = jnp.pad(x, ((0, 0), (0, 0), (0, s_pad - S)))
        t = jnp.pad(t, ((0, 0), (0, s_pad - S)))
    t3 = t.reshape(N, 1, s_pad)

    # ---- kernel 1: channel softmax + exact fg mask, tiled over S (independent tiles -> "parallel")
    p, fgmask = pl.pallas_call(
        _softmax_kernel,
        grid=(n_tiles,),
        in_specs=[pl.BlockSpec((N, C, ts), lambda s: (0, 0, s))],
        out_specs=[pl.BlockSpec((N, nfg, ts), lambda s: (0, 0, s)),
                   pl.BlockSpec((N, nfg, ts), lambda s: (0, 0, s))],
        out_shape=(jax.ShapeDtypeStruct((N, nfg, s_pad), jnp.bfloat16),
                   jax.ShapeDtypeStruct((N, nfg, s_pad), jnp.bfloat16)),
        compiler_params=pltpu.CompilerParams(
            dimension_semantics=("parallel",)),
    )(x)

    # ---- distance transforms of the thresholded masks (plain JAX / XLA, separable exact EDT)
    # EDT(m) and EDT(~m) have disjoint supports, so (EDT(m)+EDT(~m))**2 == EDT(m)**2+EDT(~m)**2
    # pointwise; everything is therefore computed directly as squared distances (no sqrt).
    pc_mask = fgmask[..., :S] > 0.5                              # (N, nfg, S) bool (exact)
    cls = jnp.arange(1, C, dtype=jnp.int32).reshape(1, nfg, 1)
    gt_mask = t3[..., :S] == cls                                 # (N, nfg, S) bool
    masks = jnp.concatenate(
        [pc_mask, jnp.logical_not(pc_mask), gt_mask, jnp.logical_not(gt_mask)], axis=0)
    e2 = _edt_sq(masks.reshape(4 * N * nfg, H, W)).reshape(4, N, nfg, S)
    dist = (e2[0] + e2[1] + e2[2] + e2[3]).astype(jnp.float32)   # pc_dist**2 + gt_dist**2
    if s_pad != S:
        dist = jnp.pad(dist, ((0, 0), (0, 0), (0, s_pad - S)))   # zero weight on padding

    # ---- kernel 2: tiled weighted-SSE accumulation, grid (N "parallel", S-tiles "arbitrary")
    acc = pl.pallas_call(
        functools.partial(_weighted_sse_kernel, num_fg=nfg),
        grid=(N, n_tiles),
        in_specs=[
            pl.BlockSpec((1, nfg, ts), lambda n, s: (n, 0, s)),  # p (bf16)
            pl.BlockSpec((1, nfg, ts), lambda n, s: (n, 0, s)),  # dist (f32)
            pl.BlockSpec((1, 1, ts), lambda n, s: (n, 0, s)),    # target labels (i32)
        ],
        out_specs=pl.BlockSpec((1, nfg, ts), lambda n, s: (n, 0, 0)),  # resident accumulator
        out_shape=jax.ShapeDtypeStruct((N, nfg, ts), jnp.float32),
        compiler_params=pltpu.CompilerParams(
            dimension_semantics=("parallel", "arbitrary")),
    )(p, dist, t3)

    # sum over classes of per-class means; every class shares the divisor N*H*W,
    # so the tiny finalize reduction is left to XLA (no scalar store in the kernel).
    return jnp.sum(acc) / jnp.float32(N * S)


# ----------------------------------------------------------------------------- reference

def _pairwise_sq_dists(H, W):
    """(S, S) squared Euclidean distances between all pixel pairs of an HxW grid."""
    idx = jnp.arange(H * W, dtype=jnp.int32)
    yy = (idx // W).astype(jnp.float32)
    xx = (idx % W).astype(jnp.float32)
    return (yy[:, None] - yy[None, :]) ** 2 + (xx[:, None] - xx[None, :]) ** 2


def _edt_bruteforce(mask, d2):
    """Brute-force exact EDT (reference only; small spatial sizes).

    mask: (B, S) bool.  Distance from every True pixel to the nearest False pixel; 0 on
    False pixels; 0 if there are no False pixels at all (degenerate case).
    """
    bg = jnp.logical_not(mask)
    cand = jnp.where(bg[:, None, :], d2[None, :, :], jnp.float32(1e12))
    dist = jnp.sqrt(jnp.min(cand, axis=-1))
    dist = jnp.where(mask, dist, 0.0)
    has_bg = jnp.any(bg, axis=-1, keepdims=True)
    return jnp.where(has_bg, dist, 0.0).astype(jnp.float32)


def hd_loss_ref(logits_nchw, target_nhw):
    """Pure-JAX mirror of the PyTorch HDLoss.forward (independent brute-force EDT)."""
    N, C, H, W = logits_nchw.shape
    S = H * W
    pred = jax.nn.softmax(logits_nchw.astype(jnp.float32), axis=1).reshape(N, C, S)
    tgt = target_nhw.reshape(N, S)
    d2 = _pairwise_sq_dists(H, W)
    loss = jnp.float32(0.0)
    for i in range(1, C):
        pc = pred[:, i, :]                                   # (N, S)
        gt = (tgt == i).astype(jnp.float32)                  # (N, S)
        pcm = pc > 0.5
        gtm = gt > 0.5
        pc_dist = _edt_bruteforce(pcm, d2) + _edt_bruteforce(jnp.logical_not(pcm), d2)
        gt_dist = _edt_bruteforce(gtm, d2) + _edt_bruteforce(jnp.logical_not(gtm), d2)
        pred_error = (gt - pc) ** 2
        dist = pc_dist ** 2 + gt_dist ** 2
        loss = loss + jnp.mean(pred_error * dist)
    return loss


if __name__ == "__main__":
    key = jax.random.PRNGKey(0)
    k1, k2 = jax.random.split(key)

    N, C, H, W = 2, 4, 16, 16
    # confident logits so the >0.5 foreground masks are non-trivial
    logits = 3.0 * jax.random.normal(k1, (N, C, H, W), dtype=jnp.float32)
    target = jax.random.randint(k2, (N, H, W), 0, C, dtype=jnp.int32)

    # ts=128 -> 2 spatial tiles at this toy size, exercising the pipelined accumulation.
    out = hd_loss(logits, target, ts=128)
    out = jax.block_until_ready(out)

    ref = hd_loss_ref(logits, target)
    # bf16 probabilities + approx reciprocal in the kernel path; the 0.5 masks are exact,
    # so the remaining differences are continuous -> 1e-2 relative tolerance is ample.
    assert jnp.allclose(out, ref, rtol=1e-2, atol=1e-3), (out, ref)

    print("KERNEL_OK")
</pallas_src>

<mosaic_0001>
module attributes {stable_mosaic.version = 11 : i64} {
  func.func @_softmax_kernel(%arg0: i32, %arg1: memref<2x4x128xf32, #tpu.memory_space<vmem>>, %arg2: memref<2x3x128xbf16, #tpu.memory_space<vmem>>, %arg3: memref<2x3x128xbf16, #tpu.memory_space<vmem>>) attributes {dimension_semantics = [#tpu.dimension_semantics<parallel>], iteration_bounds = array<i64: 2>, scalar_prefetch = 0 : i64, scratch_operands = 0 : i64, tpu.core_type = #tpu.core_type<tc>, window_params = [{transform_indices = @transform_0, window_bounds = array<i64: 2, 4, 128>}, {transform_indices = @transform_1, window_bounds = array<i64: 2, 3, 128>}, {transform_indices = @transform_2, window_bounds = array<i64: 2, 3, 128>}]} {
    %c0 = arith.constant 0 : index
    %c0_0 = arith.constant 0 : index
    %c0_1 = arith.constant 0 : index
    %0 = vector.load %arg1[%c0, %c0_0, %c0_1] : memref<2x4x128xf32, #tpu.memory_space<vmem>>, vector<2x4x128xf32>
    %cst = arith.constant dense<0xFF800000> : vector<2x128xf32>
    %1 = vector.multi_reduction <maximumf>, %0, %cst [1] : vector<2x4x128xf32> to vector<2x128xf32>
    %2 = vector.shape_cast %1 : vector<2x128xf32> to vector<2x1x128xf32>
    %3 = vector.broadcast %2 : vector<2x1x128xf32> to vector<2x4x128xf32>
    %4 = arith.subf %0, %3 : vector<2x4x128xf32>
    %5 = math.exp %4 : vector<2x4x128xf32>
    %cst_2 = arith.constant dense<0.000000e+00> : vector<2x128xf32>
    %6 = vector.multi_reduction <add>, %5, %cst_2 [1] : vector<2x4x128xf32> to vector<2x128xf32>
    %7 = vector.shape_cast %6 : vector<2x128xf32> to vector<2x1x128xf32>
    %8 = vector.extract_strided_slice %5 {offsets = [0, 1, 0], sizes = [2, 3, 128], strides = [1, 1, 1]} : vector<2x4x128xf32> to vector<2x3x128xf32>
    %9 = tpu.reciprocal %7 {approx = true} : vector<2x1x128xf32> -> vector<2x1x128xf32>
    %10 = vector.broadcast %9 : vector<2x1x128xf32> to vector<2x3x128xf32>
    %11 = arith.mulf %8, %10 : vector<2x3x128xf32>
    %12 = arith.truncf %11 : vector<2x3x128xf32> to vector<2x3x128xbf16>
    %c0_3 = arith.constant 0 : index
    %c0_4 = arith.constant 0 : index
    %c0_5 = arith.constant 0 : index
    %13 = vector.load %arg2[%c0_3, %c0_4, %c0_5] : memref<2x3x128xbf16, #tpu.memory_space<vmem>>, vector<2x3x128xbf16>
    tpu.vector_store %arg2[%c0_3, %c0_4, %c0_5], %12 {strides = array<i32>} : memref<2x3x128xbf16, #tpu.memory_space<vmem>>, vector<2x3x128xbf16>,
    %cst_6 = arith.constant 2.000000e+00 : f32
    %14 = vector.broadcast %cst_6 : f32 to vector<2x3x128xf32>
    %15 = arith.mulf %14, %8 : vector<2x3x128xf32>
    %16 = vector.broadcast %7 : vector<2x1x128xf32> to vector<2x3x128xf32>
    %17 = arith.cmpf ogt, %15, %16 : vector<2x3x128xf32>
    %cst_7 = arith.constant 1.000000e+00 : f32
    %cst_8 = arith.constant 0.000000e+00 : f32
    %18 = vector.broadcast %cst_7 : f32 to vector<2x3x128xf32>
    %19 = vector.broadcast %cst_8 : f32 to vector<2x3x128xf32>
    %20 = arith.select %17, %18, %19 : vector<2x3x128xi1>, vector<2x3x128xf32>
    %21 = arith.truncf %20 : vector<2x3x128xf32> to vector<2x3x128xbf16>
    %c0_9 = arith.constant 0 : index
    %c0_10 = arith.constant 0 : index
    %c0_11 = arith.constant 0 : index
    %22 = vector.load %arg3[%c0_9, %c0_10, %c0_11] : memref<2x3x128xbf16, #tpu.memory_space<vmem>>, vector<2x3x128xbf16>
    tpu.vector_store %arg3[%c0_9, %c0_10, %c0_11], %21 {strides = array<i32>} : memref<2x3x128xbf16, #tpu.memory_space<vmem>>, vector<2x3x128xbf16>,
    return
  }
  func.func @transform_0(%arg0: i32) -> (i32, i32, i32) {
    %c0_i32 = arith.constant 0 : i32
    %c0_i32_0 = arith.constant 0 : i32
    %c0_i32_1 = arith.constant 0 : i32
    return %c0_i32, %c0_i32_0, %arg0 : i32, i32, i32
  }
  func.func @transform_1(%arg0: i32) -> (i32, i32, i32) {
    %c0_i32 = arith.constant 0 : i32
    %c0_i32_0 = arith.constant 0 : i32
    %c0_i32_1 = arith.constant 0 : i32
    return %c0_i32, %c0_i32_0, %arg0 : i32, i32, i32
  }
  func.func @transform_2(%arg0: i32) -> (i32, i32, i32) {
    %c0_i32 = arith.constant 0 : i32
    %c0_i32_0 = arith.constant 0 : i32
    %c0_i32_1 = arith.constant 0 : i32
    return %c0_i32, %c0_i32_0, %arg0 : i32, i32, i32
  }
}

</mosaic_0001>

<bundles_post_ra>
// kernel: tpu_custom_call.1
= control target key start
LH: loop header
LB: loop body
LE: loop exit
PB: predicated region body
PF: predicated region fallthrough
CT: control target
= control target key end

     0   :  { %8 = vsyncpa [#allocation3], 0  ;;  %s791_s0 = inlined_call_operand.hbm [shape: f32[2,4,256], index: 0, kind: input, shape index: {}]   ;;  %s792_s1 = inlined_call_operand.vmem [shape: bf16[2,3,256], index: 1, kind: output, shape index: {0}]   ;;  %s793_s2 = inlined_call_operand.vmem [shape: bf16[2,3,256], index: 2, kind: output, shape index: {1}]  }
   0x1   :  { %10 = vsyncpa [#allocation3 + $0x1], 0  ;;  %s634_s9 = smov 0   ;;  %s636_s10 = smov 0  }
   0x2   :  { %s638_s11 = smov 0   ;;  %s640_s12 = smov 0  }
   0x3 LB: > { %s653_s13 = sadd.s32 4294967295, %s611_s12   ;;  %s656_s14 = sadd.s32 1, %s611_s12   ;;  %s611_s12 = sphi %s640_s12, %s805_s12   ;;  %s607_s11 = sphi %s638_s11, %s804_s11   ;;  %s603_s10 = sphi %s636_s10, %s803_s10   ;;  %s599_s9 = sphi %s634_s9, %s802_s9  }
   0x4   : > { %s20_s15 = ssub.s32 %s611_s12, %s656_s14  ;;  %s23_s16 = sadd.s32 1, %s607_s11 }
   0x5   : > { %p21_p0 = scmp.eq.s32.totalorder %s20_s15, 0  ;;  %p30_p1 = scmp.ne.s32.totalorder %s607_s11, %s603_s10 }
   0x6   : > { %p31_p2 = scmp.eq.s32.totalorder %s611_s12, 0  ;;  %p36_p3 = scmp.ne.s32.totalorder %s603_s10, %s599_s9 }
   0x7   : > { %s666_s17 = scalar_select %p21_p0, %s607_s11, %s23_s16  }
   0x8   : > { %p668_p4 = por %p31_p2, %p30_p1  ;;  %p37_p5 = scmp.eq.s32.totalorder %s653_s13, 0 }
   0x9   : > { %p60_p6 = scmp.eq.s32.totalorder %s653_s13, 1  ;;  %p501_p8 = scmp.lt.s32.totalorder %s611_s12, 2 }
   0xa   : > { %p674_p7 = por %p37_p5, %p36_p3  ;;  %s112_s21 = sand.u32 1, %s607_s11  }
   0xb   : > { %p679_p9 = por %p60_p6, %p30_p1  ;;  %s483_s22 = sshll.u32 %s112_s21, 3 }
   0xc   : > { %s484_s23 = sshll.u32 %s611_s12, 6  ;;  %s116_s27 = scalar_lea.vmem [#allocation2], %s483_s22 }
   0xd   : > { %s796_s20 = scalar_select %p679_p9, 1, 0 }
   0xe   : > { %s688_s26 = scalar_lea.hbm %s791_s0, %s484_s23  ;;  %s122_s28 = sshll.u32 %s116_s27, 4  ;;  %s690_s28 = int_to_ptr.vmem [resolvable:$true] %s122_s28 }
   0xf   : > { %p694_p10 = pnand %p501_p8, %p668_p4  ;;  %s698_s30 = scalar_lea.sflag [#allocation3], %s112_s21 }
  0x10   : > { %s547_s3 = scalar_lea.hbm %s688_s26, 128  ;;  %s552_s6 = scalar_lea.hbm %s791_s0, 256 }
  0x11   : > { %p548_p11 = scmp.ne.s32.totalorder %s688_s26, %s547_s3  ;;  %p549_p12 = pneg %p694_p10 }
  0x12   : > { %p553_p1 = scmp.lt.u32.totalorder %s688_s26, %s791_s0  ;;  %p554_p2 = scmp.lt.u32.totalorder %s552_s6, %s547_s3 }
  0x13   : > { %p550_p13 = pnand %p549_p12, %p548_p11  ;;  %p556_p4 = scmp.lt.u32.totalorder %s547_s3, %s688_s26 }
  0x14   : > { %p555_p3 = por %p554_p2, %p553_p1 }
  0x15   : > { %p551_p0 = pneg %p550_p13 }
  0x16   : > { %p557_p5 = por %p556_p4, %p555_p3 }
  0x18   : > { %p558_p6 = pnand %p557_p5, %p551_p0 }
  0x1a   : > { %561 = shalt.err (!%p558_p6)
}
  0x1b   : > { %s562_s9 = scalar_lea.vmem %s690_s28, 128  ;;  %s613_s15 = smov [#allocation2]  }
  0x1c   : > { %p563_p8 = scmp.ne.s32.totalorder %s690_s28, %s562_s9  ;;  %s567_s16 = sshll.u32 %s613_s15, 4  ;;  %s568_s16 = int_to_ptr.vmem [resolvable:$false] %s567_s16 }
  0x1d   : > { %s569_s18 = scalar_lea.vmem %s568_s16, 256  ;;  %p570_p9 = scmp.lt.s32.totalorder %s690_s28, %s568_s16 }
  0x1e   : > { %p565_p11 = pnand %p563_p8, %p549_p12  ;;  %p571_p1 = scmp.lt.s32.totalorder %s569_s18, %s562_s9 }
  0x20   : > { %p566_p13 = pneg %p565_p11  ;;  %p572_p2 = por %p571_p1, %p570_p9 }
  0x22   : > { %p573_p3 = pnand %p572_p2, %p566_p13 }
  0x24   : > { %576 = shalt.err (!%p573_p3)
}
  0x25   : > { %s614_s21 = smov 128   ;;  %s615_s22 = smov 64  }
  0x26   : > { %s616_s23 = smov 4   ;;  %p485_p12 = scmp.ge.s32.totalorder %s611_s12, 1 }
  0x27   : > { %500 = dma.hbm_to_vmem [thread:$0]  (!%p694_p10), %s688_s26, 128, %s690_s28, %s698_s30, %s614_s21, %s615_s22, %s616_s23  }
  0x28   : > { %p130_p0 = scmp.lt.s32.totalorder %s611_s12, 3 }
  0x2a   : > { %p131_p4 = pnand %p485_p12, %p130_p0 }
  0x2b   : > { %s729_s24 = sand.u32 (!%p131_p4), 1, %s603_s10  }
  0x2c   : > { %134 = sbr.rel (%p131_p4) target bundleno = 139 (0x8b), region = 24  ;;  %s486_s25 = sshll.u32 (!%p131_p4), %s729_s24, 3 }
  0x2d   : > { %s137_s27 = scalar_lea.sflag (!%p131_p4), [#allocation3], %s729_s24  ;;  %s140_s3 = scalar_lea.vmem (!%p131_p4), [#allocation2], %s486_s25 }
  0x33   : > { %594 = dma.done.wait (%p674_p7), %s137_s27, 128  }
  0x34   : > { %596 = vsyncadd (%p674_p7), %s137_s27, 4294967168  ;;  %vm166_vm0 = vcmask 1043456   ;;  %v164_v0 = vld [vmem:[%s140_s3] sm:$0xf]  ;;  %v165_v1 = vld [vmem:[%s140_s3 + $0x4] sm:$0xf]  ;;  %v212_v31 = vlaneseq }
  0x35   : > { %v167_v2 = vsel %vm166_vm0, %v164_v0, -inf  ;;  %v174_v3 = vsel %vm166_vm0, %v165_v1, -inf  ;;  %v617_v29 = vmov 1983009808   ;;  %v618_v44 = vmov 0.0   ;;  %s487_s12 = sshll.u32 %s729_s24, 2 }
  0x36   : > { %v168_v4 = vrot.slane %v167_v2, 4  ;;  %v175_v5 = vrot.slane %v174_v3, 4  ;;  %v210_v30 = vunpack.c.l.s4 %v617_v29  ;;  %v213_v37 = vshrl.u32 %v212_v31, 7  ;;  %s748_s19 = scalar_lea.vmem [#allocation5], %s487_s12  ;;  %s157_s26 = scalar_lea.vmem [#allocation4], %s487_s12 }
  0x37   : > { %vm243_vm3 = vcmask 1041408   ;;  %vm244_vm4 = vsmask.f32 1280  ;;  %p800_p7 = scmp.ne.s32.totalorder %s796_s20, 0 }
  0x38   : > { %v169_v6 = vmax.f32 %v167_v2, %v168_v4  ;;  %v176_v7 = vmax.f32 %v174_v3, %v175_v5  ;;  %v211_v36 = vunpack.c.0.s8 %v210_v30  ;;  %vm742_vm5 = vmand %vm243_vm3, %vm244_vm4  ;;  %v299_v4 = vld [vmem:[%s748_s19 + $0x2] sm:$0x3]  ;;  %s491_s28 = sshll.u32 (%p800_p7), %s653_s13, 1 }
  0x39   : > { %s314_s4 = scalar_lea.vmem (%p800_p7), %s792_s1, %s491_s28 }
  0x3a   : > { %v170_v8 = vrot.slane %v169_v6, 2  ;;  %v177_v9 = vrot.slane %v176_v7, 2  ;;  %v214_v43 = vsub.s32 %v211_v36, %v213_v37 }
  0x3c   : > { %v171_v10 = vmax.f32 %v169_v6, %v170_v8  ;;  %v178_v11 = vmax.f32 %v176_v7, %v177_v9 }
  0x3e   : > { %v172_v12 = vrot.slane %v171_v10, 1  ;;  %v179_v13 = vrot.slane %v178_v11, 1 }
  0x40   : > { %v173_v14 = vmax.f32 %v171_v10, %v172_v12  ;;  %v180_v15 = vmax.f32 %v178_v11, %v179_v13 }
  0x42   : > { %v181_v16 = vsub.f32 %v164_v0, %v173_v14  ;;  %v182_v17 = vsub.f32 %v165_v1, %v180_v15  ;;  %v296_v0 = vld [vmem:[%s748_s19] sm:$0x3] }
  0x44   : > { %v183_v18 = vmul.f32 1.442695, %v181_v16  ;;  %v185_v19 = vmul.f32 1.442695, %v182_v17 }
  0x46   : > { %539 = vpow2.f32 %v183_v18 }
  0x47   : > { %541 = vpow2.f32 %v185_v19 }
  0x50   : > { %v540_v20 = vpop.eup %539 }
  0x51   : > { %v542_v21 = vpop.eup %541  ;;  %v187_v22 = vsel %vm166_vm0, %v540_v20, 0.0  ;;  %v252_v38 = vmul.f32 2.0, %v540_v20 }
  0x52   : > { %v188_v23 = vrot.slane %v187_v22, 4  ;;  %v194_v24 = vsel %vm166_vm0, %v542_v21, 0.0  ;;  %v253_v40 = vmul.f32 2.0, %v542_v21 }
  0x53   : > { %v195_v25 = vrot.slane %v194_v24, 4 }
  0x54   : > { %v189_v26 = vadd.f32 %v188_v23, %v187_v22 }
  0x55   : > { %v196_v27 = vadd.f32 %v195_v25, %v194_v24  ;;  %v249_v24 = vld [vmem:[%s157_s26 + $0x2] sm:$0x3] }
  0x56   : > { %v190_v28 = vrot.slane %v189_v26, 2 }
  0x57   : > { %v197_v32 = vrot.slane %v196_v27, 2 }
  0x58   : > { %v191_v33 = vadd.f32 %v190_v28, %v189_v26 }
  0x59   : > { %v198_v34 = vadd.f32 %v197_v32, %v196_v27 }
  0x5a   : > { %v192_v35 = vrot.slane %v191_v33, 1 }
  0x5b   : > { %v199_v39 = vrot.slane %v198_v34, 1 }
  0x5c   : > { %v193_v41 = vadd.f32 %v192_v35, %v191_v33 }
  0x5d   : > { %v200_v42 = vadd.f32 %v199_v39, %v198_v34 }
  0x5e   : > { %543 = vrcp.f32 %v193_v41  ;;  %vm254_vm1 = vcmp.gt.f32.partialorder %v252_v38, %v193_v41 }
  0x5f   : > { %545 = vrcp.f32 %v200_v42  ;;  %v256_v45 = vsel %vm254_vm1, 1.0, %v618_v44  ;;  %vm255_vm2 = vcmp.gt.f32.partialorder %v253_v40, %v200_v42 }
  0x60   : > { %v258_v46 = vpack.c.bf16 %v256_v45, %v256_v45  ;;  %v257_v47 = vsel %vm255_vm2, 1.0, %v618_v44 }
  0x61   : > { %v259_v48 = vpack.c.bf16 %v257_v47, %v257_v47 }
  0x62   : > { %v268_v49 = vrot.slane %v258_v46, %v214_v43 }
  0x63   : > { %v275_v50 = vrot.slane %v259_v48, %v214_v43 }
  0x64   : > { %v277_v51 = vshrl.u32 %v268_v49, 16  ;;  %v280_v52 = vshll.u32 %v268_v49, 16 }
  0x65   : > { %v286_v53 = vshrl.u32 %v275_v50, 16  ;;  %v289_v54 = vshll.u32 %v275_v50, 16 }
  0x66   : > { %v279_v55 = vrot.slane %v277_v51, 6  ;;  %v282_v56 = vrot.slane %v280_v52, 7 }
  0x67   : > { %v288_v57 = vrot.slane %v286_v53, 6  ;;  %v291_v58 = vrot.slane %v289_v54, 7 }
  0x68   : > { %v544_v59 = vpop.eup %543  ;;  %v283_v60 = vor.u32 %v282_v56, %v279_v55 }
  0x69   : > { %v546_v61 = vpop.eup %545  ;;  %v203_v62 = vmul.f32 %v544_v59, %v540_v20  ;;  %v292_v1 = vor.u32 %v291_v58, %v288_v57 }
  0x6a   : > { %v204_v2 = vmul.f32 %v546_v61, %v542_v21  ;;  %v284_v3 = vrot.slane %v283_v60, 2  ;;  %v246_v21 = vld [vmem:[%s157_s26] sm:$0x3] }
  0x6b   : > { %v205_v5 = vpack.c.bf16 %v203_v62, %v203_v62  ;;  %v293_v6 = vrot.slane %v292_v1, 2 }
  0x6c   : > { %v206_v7 = vpack.c.bf16 %v204_v2, %v204_v2  ;;  %v297_v8 = vsel %vm742_vm5, %v284_v3, %v296_v0 }
  0x6d   : > { %v215_v9 = vrot.slane %v205_v5, %v214_v43  ;;  %298 = vst [vmem:[%s748_s19] sm:$0x3] %v297_v8  ;;  %v300_v10 = vsel %vm742_vm5, %v293_v6, %v299_v4 }
  0x6e   : > { %v222_v11 = vrot.slane %v206_v7, %v214_v43  ;;  %301 = vst [vmem:[%s748_s19 + $0x2] sm:$0x3] %v300_v10 }
  0x6f   : > { %v224_v12 = vshrl.u32 %v215_v9, 16  ;;  %v227_v13 = vshll.u32 %v215_v9, 16 }
  0x70   : > { %v233_v14 = vshrl.u32 %v222_v11, 16  ;;  %v236_v15 = vshll.u32 %v222_v11, 16 }
  0x71   : > { %v226_v16 = vrot.slane %v224_v12, 6  ;;  %v229_v17 = vrot.slane %v227_v13, 7 }
  0x72   : > { %v235_v18 = vrot.slane %v233_v14, 6  ;;  %v238_v19 = vrot.slane %v236_v15, 7 }
  0x73   : > { %v230_v20 = vor.u32 %v229_v17, %v226_v16  ;;  %312 = sbr.rel (!%p800_p7) target bundleno = 130 (0x82), region = 32 }
  0x74   : > { %v239_v22 = vor.u32 %v238_v19, %v235_v18 }
  0x75   : > { %v231_v23 = vrot.slane %v230_v20, 2 }
  0x76   : > { %v240_v25 = vrot.slane %v239_v22, 2 }
  0x77   : > { %v247_v26 = vsel %vm742_vm5, %v231_v23, %v246_v21 }
  0x78   : > { %248 = vst [vmem:[%s157_s26] sm:$0x3] %v247_v26  ;;  %v250_v27 = vsel %vm742_vm5, %v240_v25, %v249_v24 }
  0x79   : > { %251 = vst [vmem:[%s157_s26 + $0x2] sm:$0x3] %v250_v27 }
  0x7f   : > { %v330_v28 = vld [vmem:[%s157_s26] sm:$0x3] }
  0x80   : > { %v332_v29 = vld [vmem:[%s157_s26 + $0x2] sm:$0x3]  ;;  %331 = vst [vmem:[%s314_s4] sm:$0x3] %v330_v28 }
  0x81   : > { %333 = vst [vmem:[%s314_s4 + $0x4] sm:$0x3] %v332_v29 }
  0x82 PF: > { %p801_p9 = scmp.ne.s32.totalorder %s796_s20, 0 }
  0x83   : > { %s492_s5 = sshll.u32 (%p801_p9), %s653_s13, 1  ;;  %v370_v30 = vld [vmem:[%s748_s19] sm:$0x3] (%p801_p9)  ;;  %v372_v31 = vld [vmem:[%s748_s19 + $0x2] sm:$0x3] (%p801_p9) }
  0x84   : > { %352 = sbr.rel (!%p801_p9) target bundleno = 139 (0x8b), region = 66  ;;  %s354_s8 = scalar_lea.vmem (%p801_p9), %s793_s2, %s492_s5 }
  0x85   : > { %371 = vst [vmem:[%s354_s8] sm:$0x3] (%p801_p9), %v370_v30  ;;  %373 = vst [vmem:[%s354_s8 + $0x4] sm:$0x3] (%p801_p9), %v372_v31 }
  0x8b PF: > { %p13_p10 = scmp.ge.s32.totalorder %s656_s14, 4   ;;  %s802_s9 = smov %s603_s10 }
  0x8c   : > { %s803_s10 = smov %s607_s11  ;;  %s804_s11 = smov %s666_s17 }
  0x8d   : > { %s805_s12 = smov %s656_s14  ;;  %15 = sbr.rel (!%p13_p10) target bundleno = 3 (0x3), region = 144 }
  0x94   :  { %409 = vsyncpa [#allocation3], 1 }
  0x95   :  { %411 = vsyncpa [#allocation3 + $0x1], 1 }

</bundles_post_ra>
